<compile_context>
chip_gen: v5e
topology: v5e:2x2
jax: 0.10.0
libtpu: 0.0.40
codegen_flags: <defaults>
</compile_context>

<pallas_src>
import jax
import jax.numpy as jnp
import numpy as np
from jax.experimental import pallas as pl
from jax.experimental.pallas import tpu as pltpu


# ---------------------------------------------------------------------------
# Fused ChebConv kernel: one grid step per batch element.
#   l_ref : (N, N)            resident laplacian (compute dtype)
#   x_ref : (1, N, C)         per-batch input block (compute dtype)
#   w_ref : ((K+1)*C, Dp)     resident flattened+padded weight (compute dtype)
#   b_ref : (1, Dp)           resident padded bias (f32)
#   o_ref : (1, N, Dp)        f32 output block (lane-dense, Dp % 128 == 0)
#   z_ref : (N, (K+1)*C)      VMEM scratch slab holding [z_0 | z_1 | ... | z_K]
# ---------------------------------------------------------------------------
def chebconv_kernel(l_ref, x_ref, w_ref, b_ref, o_ref, z_ref):
    c = x_ref.shape[2]
    k_order = w_ref.shape[0] // c          # K + 1 (static)
    cdt = l_ref.dtype                      # compute dtype (f32 or bf16)

    x = x_ref[0]                           # (N, C)

    # k = 0: T_0 = I  =>  z_0 = x  (no identity matmul, no identity DMA)
    z_ref[:, 0:c] = x

    if k_order >= 2:
        lap = l_ref[...]                   # (N, N)
        # k = 1: z_1 = L @ x  (accumulate in f32 on the MXU)
        z_prev2 = x.astype(jnp.float32)
        z_prev1 = jnp.dot(lap, x, preferred_element_type=jnp.float32)
        z_ref[:, c:2 * c] = z_prev1.astype(cdt)
        # k >= 2: z_k = 2 L z_{k-1} - z_{k-2}; recurrence stays in f32,
        # only the matmul *inputs* are cast to the compute dtype.
        for k in range(2, k_order):
            zk = 2.0 * jnp.dot(lap, z_prev1.astype(cdt),
                               preferred_element_type=jnp.float32) - z_prev2
            z_ref[:, k * c:(k + 1) * c] = zk.astype(cdt)
            z_prev2, z_prev1 = z_prev1, zk

    # One wide-contraction matmul over the fused (K+1)*C axis, f32 accumulate.
    out = jnp.dot(z_ref[...], w_ref[...], preferred_element_type=jnp.float32)
    o_ref[0] = (out + b_ref[...]).astype(o_ref.dtype)


def _round_up(v, m):
    return ((v + m - 1) // m) * m


def chebconv_forward(x, graph, weight, bias, *, use_bf16=False):
    """x: [B,N,C], graph: [N,N], weight: [K+1,C,D], bias: [1,D] -> [B,N,D]."""
    B, N, C = x.shape
    k_order, wc, D = weight.shape
    assert wc == C
    kc = k_order * C

    # Lane-dense output: pad D (weight cols / bias / output) to a multiple
    # of 128 so output stores are full-lane vst; slice back afterwards.
    LANE = 128
    Dp = _round_up(D, LANE)
    w_flat = weight.reshape(kc, D)                       # rows: [W_0; W_1; ...]
    if Dp != D:
        w_flat = jnp.pad(w_flat, ((0, 0), (0, Dp - D)))
        bias_p = jnp.pad(bias, ((0, 0), (0, Dp - D)))
    else:
        bias_p = bias

    cdt = jnp.bfloat16 if use_bf16 else jnp.float32
    lap_c = graph.astype(cdt)
    x_c = x.astype(cdt)
    w_c = w_flat.astype(cdt)
    bias_f = bias_p.astype(jnp.float32)

    out = pl.pallas_call(
        chebconv_kernel,
        out_shape=jax.ShapeDtypeStruct((B, N, Dp), jnp.float32),
        grid_spec=pltpu.PrefetchScalarGridSpec(
            num_scalar_prefetch=0,
            grid=(B,),                                   # batch only; no k axis
            in_specs=[
                pl.BlockSpec((N, N), lambda b: (0, 0)),      # L, resident
                pl.BlockSpec((1, N, C), lambda b: (b, 0, 0)),  # x[b]
                pl.BlockSpec((kc, Dp), lambda b: (0, 0)),    # W_flat, resident
                pl.BlockSpec((1, Dp), lambda b: (0, 0)),     # bias, resident
            ],
            out_specs=pl.BlockSpec((1, N, Dp), lambda b: (b, 0, 0)),
            scratch_shapes=[pltpu.VMEM((N, kc), cdt)],       # Z slab
        ),
        compiler_params=pltpu.CompilerParams(
            dimension_semantics=("parallel",),               # megacore over b
        ),
    )(lap_c, x_c, w_c, bias_f)

    return out[..., :D]


# ---------------------------------------------------------------------------
# Parameter init (deterministic, mirrors nn.init.xavier_normal_ / zeros_)
# ---------------------------------------------------------------------------
def init_params(key, in_c, out_c, K):
    k_order = K + 1
    # torch xavier_normal_ on [K+1, 1, in_c, out_c]:
    #   fan_in = 1*in_c*out_c, fan_out = (K+1)*in_c*out_c
    fan_in = 1 * in_c * out_c
    fan_out = k_order * in_c * out_c
    std = float(np.sqrt(2.0 / (fan_in + fan_out)))
    weight = std * jax.random.normal(key, (k_order, 1, in_c, out_c), jnp.float32)
    bias = jnp.zeros((1, 1, out_c), jnp.float32)
    return weight, bias


# ---------------------------------------------------------------------------
# Pure-JAX reference (mirrors the torch module exactly)
# ---------------------------------------------------------------------------
def reference_forward(x, graph, weight, bias, K):
    k_order = K + 1
    n = graph.shape[0]
    polys = [jnp.eye(n, dtype=jnp.float32)]
    if k_order >= 2:
        polys.append(graph)
        for _ in range(2, k_order):
            polys.append(2.0 * graph @ polys[-1] - polys[-2])
    mul_l = jnp.stack(polys)[:, None]                    # [K+1, 1, N, N]
    res = jnp.matmul(mul_l, x)                           # [K+1, B, N, C]
    res = jnp.matmul(res, weight)                        # [K+1, B, N, D]
    return jnp.sum(res, axis=0) + bias                   # [B, N, D]


if __name__ == "__main__":
    B, N, in_c, out_c, K = 2, 16, 4, 8, 3

    key = jax.random.PRNGKey(0)
    kx, kg, kw = jax.random.split(key, 3)

    x = jax.random.normal(kx, (B, N, in_c), jnp.float32)
    graph = jax.random.normal(kg, (N, N), jnp.float32) * 0.1
    weight4d, bias3d = init_params(kw, in_c, out_c, K)

    # squeeze glue for the kernel layout
    weight = weight4d[:, 0]          # [K+1, C, D]
    bias = bias3d[0]                 # [1, D]

    ref = reference_forward(x, graph, weight4d, bias3d, K)

    # f32 path (tight correctness check)
    out = jax.block_until_ready(chebconv_forward(x, graph, weight, bias))
    np.testing.assert_allclose(np.asarray(out), np.asarray(ref),
                               rtol=1e-4, atol=1e-4)

    # bf16 compute path (v5e/v6e MXU-rate optimization); f32 accumulation,
    # so only a loose sanity check is expected to hold.
    out_bf16 = jax.block_until_ready(
        chebconv_forward(x, graph, weight, bias, use_bf16=True))
    np.testing.assert_allclose(np.asarray(out_bf16), np.asarray(ref),
                               rtol=1e-1, atol=1e-1)

    print("KERNEL_OK")
</pallas_src>

<mosaic_0001>
module attributes {stable_mosaic.version = 11 : i64} {
  func.func @chebconv_kernel(%arg0: i32, %arg1: memref<16x16xf32, #tpu.memory_space<vmem>>, %arg2: memref<1x16x4xf32, #tpu.memory_space<vmem>>, %arg3: memref<16x128xf32, #tpu.memory_space<vmem>>, %arg4: memref<1x128xf32, #tpu.memory_space<vmem>>, %arg5: memref<1x16x128xf32, #tpu.memory_space<vmem>>, %arg6: memref<16x16xf32, #tpu.memory_space<vmem>>) attributes {dimension_semantics = [#tpu.dimension_semantics<parallel>], iteration_bounds = array<i64: 2>, scalar_prefetch = 0 : i64, scratch_operands = 1 : i64, tpu.core_type = #tpu.core_type<tc>, window_params = [{pipeline_mode = #tpu.pipeline_mode<synchronous>, transform_indices = @transform_0, window_bounds = array<i64: 16, 16>}, {transform_indices = @transform_1, window_bounds = array<i64: 1, 16, 4>}, {pipeline_mode = #tpu.pipeline_mode<synchronous>, transform_indices = @transform_2, window_bounds = array<i64: 16, 128>}, {pipeline_mode = #tpu.pipeline_mode<synchronous>, transform_indices = @transform_3, window_bounds = array<i64: 1, 128>}, {transform_indices = @transform_4, window_bounds = array<i64: 1, 16, 128>}]} {
    %c0 = arith.constant 0 : index
    %c0_0 = arith.constant 0 : index
    %c0_1 = arith.constant 0 : index
    %0 = vector.load %arg2[%c0, %c0_0, %c0_1] : memref<1x16x4xf32, #tpu.memory_space<vmem>>, vector<1x16x4xf32>
    %1 = vector.shape_cast %0 : vector<1x16x4xf32> to vector<16x4xf32>
    %c0_2 = arith.constant 0 : index
    %c0_3 = arith.constant 0 : index
    %2 = vector.load %arg6[%c0_2, %c0_3] : memref<16x16xf32, #tpu.memory_space<vmem>>, vector<16x4xf32>
    tpu.vector_store %arg6[%c0_2, %c0_3], %1 {strides = array<i32>} : memref<16x16xf32, #tpu.memory_space<vmem>>, vector<16x4xf32>,
    %c0_4 = arith.constant 0 : index
    %c0_5 = arith.constant 0 : index
    %3 = vector.load %arg1[%c0_4, %c0_5] : memref<16x16xf32, #tpu.memory_space<vmem>>, vector<16x16xf32>
    %cst = arith.constant dense<0.000000e+00> : vector<16x4xf32>
    %4 = tpu.matmul %3, %1, %cst {dimension_numbers = #tpu.dot_dimension_numbers<[1], [0], [0], [1], [0, 0, 1, 1], [], []>} : vector<16x16xf32>, vector<16x4xf32>, vector<16x4xf32> -> vector<16x4xf32>
    %c0_6 = arith.constant 0 : index
    %c4 = arith.constant 4 : index
    %5 = vector.load %arg6[%c0_6, %c4] : memref<16x16xf32, #tpu.memory_space<vmem>>, vector<16x4xf32>
    tpu.vector_store %arg6[%c0_6, %c4], %4 {strides = array<i32>} : memref<16x16xf32, #tpu.memory_space<vmem>>, vector<16x4xf32>,
    %cst_7 = arith.constant dense<0.000000e+00> : vector<16x4xf32>
    %6 = tpu.matmul %3, %4, %cst_7 {dimension_numbers = #tpu.dot_dimension_numbers<[1], [0], [0], [1], [0, 0, 1, 1], [], []>} : vector<16x16xf32>, vector<16x4xf32>, vector<16x4xf32> -> vector<16x4xf32>
    %cst_8 = arith.constant 2.000000e+00 : f32
    %7 = vector.broadcast %cst_8 : f32 to vector<16x4xf32>
    %8 = arith.mulf %7, %6 : vector<16x4xf32>
    %9 = arith.subf %8, %1 : vector<16x4xf32>
    %c0_9 = arith.constant 0 : index
    %c8 = arith.constant 8 : index
    %10 = vector.load %arg6[%c0_9, %c8] : memref<16x16xf32, #tpu.memory_space<vmem>>, vector<16x4xf32>
    tpu.vector_store %arg6[%c0_9, %c8], %9 {strides = array<i32>} : memref<16x16xf32, #tpu.memory_space<vmem>>, vector<16x4xf32>,
    %cst_10 = arith.constant dense<0.000000e+00> : vector<16x4xf32>
    %11 = tpu.matmul %3, %9, %cst_10 {dimension_numbers = #tpu.dot_dimension_numbers<[1], [0], [0], [1], [0, 0, 1, 1], [], []>} : vector<16x16xf32>, vector<16x4xf32>, vector<16x4xf32> -> vector<16x4xf32>
    %cst_11 = arith.constant 2.000000e+00 : f32
    %12 = vector.broadcast %cst_11 : f32 to vector<16x4xf32>
    %13 = arith.mulf %12, %11 : vector<16x4xf32>
    %14 = arith.subf %13, %4 : vector<16x4xf32>
    %c0_12 = arith.constant 0 : index
    %c12 = arith.constant 12 : index
    %15 = vector.load %arg6[%c0_12, %c12] : memref<16x16xf32, #tpu.memory_space<vmem>>, vector<16x4xf32>
    tpu.vector_store %arg6[%c0_12, %c12], %14 {strides = array<i32>} : memref<16x16xf32, #tpu.memory_space<vmem>>, vector<16x4xf32>,
    %c0_13 = arith.constant 0 : index
    %c0_14 = arith.constant 0 : index
    %16 = vector.load %arg6[%c0_13, %c0_14] : memref<16x16xf32, #tpu.memory_space<vmem>>, vector<16x16xf32>
    %c0_15 = arith.constant 0 : index
    %c0_16 = arith.constant 0 : index
    %17 = vector.load %arg3[%c0_15, %c0_16] : memref<16x128xf32, #tpu.memory_space<vmem>>, vector<16x128xf32>
    %cst_17 = arith.constant dense<0.000000e+00> : vector<16x128xf32>
    %18 = tpu.matmul %16, %17, %cst_17 {dimension_numbers = #tpu.dot_dimension_numbers<[1], [0], [0], [1], [0, 0, 1, 1], [], []>} : vector<16x16xf32>, vector<16x128xf32>, vector<16x128xf32> -> vector<16x128xf32>
    %c0_18 = arith.constant 0 : index
    %c0_19 = arith.constant 0 : index
    %19 = vector.load %arg4[%c0_18, %c0_19] : memref<1x128xf32, #tpu.memory_space<vmem>>, vector<1x128xf32>
    %20 = vector.broadcast %19 : vector<1x128xf32> to vector<16x128xf32>
    %21 = arith.addf %18, %20 : vector<16x128xf32>
    %c0_20 = arith.constant 0 : index
    %c0_21 = arith.constant 0 : index
    %c0_22 = arith.constant 0 : index
    %22 = vector.load %arg5[%c0_20, %c0_21, %c0_22] : memref<1x16x128xf32, #tpu.memory_space<vmem>>, vector<1x16x128xf32>
    %23 = vector.shape_cast %22 : vector<1x16x128xf32> to vector<16x128xf32>
    %24 = vector.shape_cast %21 : vector<16x128xf32> to vector<1x16x128xf32>
    tpu.vector_store %arg5[%c0_20, %c0_21, %c0_22], %24 {strides = array<i32>} : memref<1x16x128xf32, #tpu.memory_space<vmem>>, vector<1x16x128xf32>,
    return
  }
  func.func @transform_0(%arg0: i32) -> (i32, i32) {
    %c0_i32 = arith.constant 0 : i32
    %c0_i32_0 = arith.constant 0 : i32
    %c0_i32_1 = arith.constant 0 : i32
    return %c0_i32, %c0_i32_0 : i32, i32
  }
  func.func @transform_1(%arg0: i32) -> (i32, i32, i32) {
    %c0_i32 = arith.constant 0 : i32
    %c0_i32_0 = arith.constant 0 : i32
    %c0_i32_1 = arith.constant 0 : i32
    return %arg0, %c0_i32, %c0_i32_0 : i32, i32, i32
  }
  func.func @transform_2(%arg0: i32) -> (i32, i32) {
    %c0_i32 = arith.constant 0 : i32
    %c0_i32_0 = arith.constant 0 : i32
    %c0_i32_1 = arith.constant 0 : i32
    return %c0_i32, %c0_i32_0 : i32, i32
  }
  func.func @transform_3(%arg0: i32) -> (i32, i32) {
    %c0_i32 = arith.constant 0 : i32
    %c0_i32_0 = arith.constant 0 : i32
    %c0_i32_1 = arith.constant 0 : i32
    return %c0_i32, %c0_i32_0 : i32, i32
  }
  func.func @transform_4(%arg0: i32) -> (i32, i32, i32) {
    %c0_i32 = arith.constant 0 : i32
    %c0_i32_0 = arith.constant 0 : i32
    %c0_i32_1 = arith.constant 0 : i32
    return %arg0, %c0_i32, %c0_i32_0 : i32, i32, i32
  }
}

</mosaic_0001>

<bundles_post_ra>
// kernel: tpu_custom_call.1
= control target key start
LH: loop header
LB: loop body
LE: loop exit
PB: predicated region body
PF: predicated region fallthrough
CT: control target
= control target key end

     0   :  { %9 = vsyncpa [#allocation4], 0  ;;  %s713_s0 = inlined_call_operand.vmem [shape: f32[16,16], index: 0, kind: input, shape index: {}]   ;;  %s714_s1 = inlined_call_operand.vmem [shape: f32[2,16,4], index: 1, kind: input, shape index: {}]   ;;  %s715_s2 = inlined_call_operand.vmem [shape: f32[16,128], index: 2, kind: input, shape index: {}]   ;;  %s716_s3 = inlined_call_operand.vmem [shape: f32[1,128], index: 3, kind: input, shape index: {}]   ;;  %s717_s4 = inlined_call_operand.hbm [shape: f32[2,16,128], index: 4, kind: output, shape index: {}]  }
   0x1   :  { %11 = vsyncpa [#allocation4 + $0x1], 0  ;;  %s596_s15 = smov 0   ;;  %s598_s16 = smov 0  }
   0x2   :  { %s600_s17 = smov 0   ;;  %s602_s18 = smov 0  }
   0x3 LB: > { %s617_s19 = sadd.s32 4294967295, %s565_s18   ;;  %s437_s20 = sadd.s32 4294967294, %s565_s18   ;;  %s565_s18 = sphi %s602_s18, %s723_s18   ;;  %s561_s17 = sphi %s600_s17, %s722_s17   ;;  %s557_s16 = sphi %s598_s16, %s721_s16   ;;  %s553_s15 = sphi %s596_s15, %s720_s15  }
   0x4   : > { %s621_s21 = sadd.s32 1, %s565_s18   ;;  %s113_s22 = sadd.s32 1, %s561_s17 }
   0x5   : > { %s110_s23 = ssub.s32 %s565_s18, %s621_s21  ;;  %p123_p0 = scmp.ne.s32.totalorder %s561_s17, %s557_s16 }
   0x6   : > { %p111_p1 = scmp.eq.s32.totalorder %s110_s23, 0  ;;  %p124_p2 = scmp.eq.s32.totalorder %s617_s19, 1 }
   0x7   : > { %p129_p3 = scmp.ne.s32.totalorder %s557_s16, %s553_s15  ;;  %p130_p4 = scmp.eq.s32.totalorder %s437_s20, 1 }
   0x8   : > { %s632_s24 = scalar_select %p111_p1, %s561_s17, %s113_s22  }
   0x9   : > { %p634_p5 = por %p124_p2, %p123_p0  ;;  %p638_p6 = por %p130_p4, %p129_p3 }
   0xa   : > { %p440_p7 = scmp.ge.s32.totalorder %s565_s18, 1  ;;  %p165_p8 = scmp.lt.s32.totalorder %s565_s18, 3 }
   0xc   : > { %p166_p9 = pnand %p440_p7, %p165_p8 }
   0xd   : > { %p191_p10 = scmp.lt.s32.totalorder (!%p166_p9), %s617_s19, 1  ;;  %s567_s10 = smov (!%p166_p9), 4  }
   0xe   : > { %169 = sbr.rel (%p166_p9) target bundleno = 712 (0x2c8), region = 36  ;;  %s568_s11 = smov (!%p166_p9), 8  }
   0xf   : > { %s569_s12 = smov (!%p166_p9), 12   ;;  %s188_s23 = sand.u32 (!%p166_p9), 1, %s557_s16  }
  0x10   : > { %s458_s30 = sshll.u32 (!%p166_p9), %s617_s19, 4  ;;  %s523_s22 = scalar_lea.hbm (!%p166_p9), %s717_s4, 32 }
  0x11   : > { %s371_s8 = scalar_lea.hbm (!%p166_p9), %s717_s4, %s458_s30 }
  0x13   : > { %s192_s27 = scalar_select %p191_p10, %s617_s19, 1  ;;  %v201_v2 = vld [vmem:[%s713_s0] sm:$0xff]  ;;  %vm203_vm0 = vcmask 130048   ;;  %v202_v3 = vld [vmem:[%s713_s0 + $0x8] sm:$0xff]  ;;  %vm198_vm1 = vcmask 31744   ;;  %vm241_vm2 = vcmask 64544  }
  0x14   : > { %vm279_vm3 = vcmask 97344   ;;  %v323_v20 = vld [vmem:[%s715_s2 + $0x8] sm:$0xff]  ;;  %v322_v21 = vld [vmem:[%s715_s2] sm:$0xff]  ;;  %vm317_vm4 = vcmask 130144  }
  0x15   : > { %s457_s28 = sshll.u32 %s192_s27, 4  ;;  %348 = vmatpush.msra.mxu3 %v323_v20  ;;  %s441_s27 = sshll.u32 %s188_s23, 4  ;;  %v502_v28 = vld [vmem:[%s716_s3] ss:$0 sm:$0xff] }
  0x16   : > { %s195_s5 = scalar_lea.vmem %s714_s1, %s457_s28 }
  0x17   : > { %v197_v0 = vld [vmem:[%s195_s5 + $0x8] sm:$0xff]  ;;  %v196_v1 = vld [vmem:[%s195_s5] sm:$0xff]  ;;  %349 = vmatpush.msra.mxu3 %v322_v21  ;;  %s190_s5 = scalar_lea.vmem [#allocation3], %s441_s27 }
  0x18   : > { %224 = vmatpush.msra.mxu0 %v197_v0  ;;  %199 = vst.msk [vmem:[#allocation2] sm:$0xff] %vm198_vm1, %v196_v1  ;;  %s372_s9 = sshll.u32 %s190_s5, 4  ;;  %s373_s9 = int_to_ptr.vmem [resolvable:$true] %s372_s9 }
  0x19   : > { %200 = vst.msk [vmem:[#allocation2 + $0x8] sm:$0xff] %vm198_vm1, %v197_v0 }
  0x1a   : > { %225 = vmatpush.msra.mxu0 %v196_v1 }
  0x1b   : > { %444 = vmatmul.msk.f32.vlgmr.msra.gmra.mxu0 %vm203_vm0, %v201_v2 }
  0x23   : > { %445 = vmatmul.msk.f32.gmra.mxu0 %vm203_vm0, %v202_v3 }
  0x98   : > { %v227_v4 = vpop.f32.mrf.mxu0 }
  0x99   : > { %235 = vrot.lane.b32.xlu0 %v227_v4, %s567_s10 }
  0xa0   : > { %v230_v5 = vpop.f32.mrf.mxu0 }
  0xa1   : > { %258 = vmatpush.msra.mxu1 %v230_v5 }
  0xa3   : > { %259 = vmatpush.msra.mxu1 %v227_v4 }
  0xa4   : > { %446 = vmatmul.msk.f32.vlgmr.msra.gmra.mxu1 %vm203_vm0, %v201_v2 }
  0xac   : > { %447 = vmatmul.msk.f32.gmra.mxu1 %vm203_vm0, %v202_v3 }
 0x10b   : > { %v236_v6 = vpop.permute.xlu0 %235 }
 0x10c   : > { %242 = vst.msk [vmem:[#allocation2] sm:$0xff] %vm241_vm2, %v236_v6 }
 0x121   : > { %v261_v7 = vpop.f32.mrf.mxu1 }
 0x122   : > { %v267_v8 = vmul.f32 2.0, %v261_v7 }
 0x124   : > { %v269_v9 = vsub.f32 %v267_v8, %v196_v1 }
 0x126   : > { %273 = vrot.lane.b32.xlu0 %v269_v9, %s568_s11 }
 0x129   : > { %v264_v10 = vpop.f32.mrf.mxu1 }
 0x12a   : > { %v268_v11 = vmul.f32 2.0, %v264_v10 }
 0x12c   : > { %v270_v12 = vsub.f32 %v268_v11, %v197_v0 }
 0x12e   : > { %275 = vrot.lane.b32.xlu2 %v270_v12, %s568_s11  ;;  %296 = vmatpush.msra.mxu2 %v270_v12 }
 0x130   : > { %297 = vmatpush.msra.mxu2 %v269_v9 }
 0x131   : > { %448 = vmatmul.msk.f32.vlgmr.msra.gmra.mxu2 %vm203_vm0, %v201_v2 }
 0x139   : > { %449 = vmatmul.msk.f32.gmra.mxu2 %vm203_vm0, %v202_v3 }
 0x188   : > { %v276_v23 = vpop.permute.xlu2 %275 }
 0x198   : > { %v274_v13 = vpop.permute.xlu0 %273 }
 0x199   : > { %280 = vst.msk [vmem:[#allocation2] sm:$0xff] %vm279_vm3, %v274_v13 }
 0x1b4   : > { %v299_v14 = vpop.f32.mrf.mxu2 }
 0x1b5   : > { %v305_v15 = vmul.f32 2.0, %v299_v14 }
 0x1b7   : > { %v307_v16 = vsub.f32 %v305_v15, %v227_v4 }
 0x1b9   : > { %311 = vrot.lane.b32.xlu1 %v307_v16, %s569_s12 }
 0x1bc   : > { %v302_v17 = vpop.f32.mrf.mxu2 }
 0x1bd   : > { %v306_v18 = vmul.f32 2.0, %v302_v17 }
 0x1bf   : > { %v308_v19 = vsub.f32 %v306_v18, %v230_v5 }
 0x1c1   : > { %237 = vrot.lane.b32.xlu1 %v230_v5, %s567_s10  ;;  %313 = vrot.lane.b32.xlu2 %v308_v19, %s569_s12  ;;  %s374_s10 = sshll.u32 %s371_s8, 4  ;;  %s360_s12 = scalar_lea.sflag [#allocation4], %s188_s23  ;;  %s375_s10 = int_to_ptr.hbm [resolvable:$true] %s374_s10 }
 0x1c2   : > { %s517_s13 = sshra.s32 %s375_s10, 4  ;;  %s518_s13 = int_to_ptr.hbm [resolvable:$true] %s517_s13 }
 0x1c3   : > { %s519_s14 = scalar_lea.hbm %s518_s13, 16  ;;  %p524_p0 = scmp.lt.s32.totalorder %s518_s13, %s717_s4 }
 0x1c4   : > { %p520_p11 = scmp.ne.s32.totalorder %s518_s13, %s519_s14  ;;  %p525_p1 = scmp.lt.s32.totalorder %s523_s22, %s519_s14 }
 0x1c6   : > { %p521_p12 = pnand %p520_p11, %p634_p5  ;;  %p526_p2 = por %p525_p1, %p524_p0 }
 0x1c8   : > { %p522_p13 = pneg %p521_p12 }
 0x1ca   : > { %p527_p3 = pnand %p526_p2, %p522_p13 }
 0x21b   : > { %v314_v26 = vpop.permute.xlu2 %313 }
 0x22b   : > { %v312_v22 = vpop.permute.xlu1 %311 }
 0x22c   : > { %318 = vst.msk [vmem:[#allocation2] sm:$0xff] %vm317_vm4, %v312_v22 }
 0x233   : > { %v238_v24 = vpop.permute.xlu1 %237  ;;  %v320_v25 = vld [vmem:[#allocation2] sm:$0xff] }
 0x234   : > { %243 = vst.msk [vmem:[#allocation2 + $0x8] sm:$0xff] %vm241_vm2, %v238_v24  ;;  %450 = vmatmul.msk.f32.vlgmr.msra.gmra.mxu3 %vm203_vm0, %v320_v25 }
 0x235   : > { %281 = vst.msk [vmem:[#allocation2 + $0x8] sm:$0xff] %vm279_vm3, %v276_v23 }
 0x236   : > { %319 = vst.msk [vmem:[#allocation2 + $0x8] sm:$0xff] %vm317_vm4, %v314_v26 }
 0x23d   : > { %v321_v27 = vld [vmem:[#allocation2 + $0x8] sm:$0xff] }
 0x23e   : > { %451 = vmatmul.msk.f32.gmra.mxu3 %vm203_vm0, %v321_v27 }
 0x2b7   : > { %v351_v29 = vpop.f32.mrf.mxu3 }
 0x2b8   : > { %v352_v30 = vadd.f32 %v502_v28, %v351_v29 }
 0x2ba   : > { %357 = vst [vmem:[%s190_s5] sm:$0xff] %v352_v30 }
 0x2c1   : > { %v354_v31 = vpop.f32.mrf.mxu3 }
 0x2c2   : > { %v355_v32 = vadd.f32 %v502_v28, %v354_v31 }
 0x2c4   : > { %358 = vst [vmem:[%s190_s5 + $0x8] sm:$0xff] %v355_v32 }
 0x2c5   : > { %530 = shalt.err (!%p527_p3)
}
 0x2c6   : > { %s570_s23 = smov 128  }
 0x2c7   : > { %459 = dma.vmem_to_hbm [thread:$0]  (%p634_p5), %s373_s9, 256, %s375_s10, %s360_s12, %s570_s23, %s570_s23, %s568_s11  }
 0x2c8 PF: > { %p465_p4 = scmp.ge.s32.totalorder %s565_s18, 2  ;;  %s389_s29 = sand.u32 1, %s553_s15  }
 0x2c9   : > { %s390_s30 = scalar_lea.sflag [#allocation4], %s389_s29 }
 0x2ca   : > { %p462_p7 = pnand %p465_p4, %p638_p6 }
 0x2cc   : > { %p463_p8 = pneg %p462_p7 }
 0x2ce   : > { %548 = dma.done.wait (%p463_p8), %s390_s30, 256  }
 0x2cf   : > { %550 = vsyncadd (%p463_p8), %s390_s30, 4294967040  ;;  %p14_p9 = scmp.ge.s32.totalorder %s621_s21, 4   ;;  %s720_s15 = smov %s557_s16 }
 0x2d0   : > { %s721_s16 = smov %s561_s17  ;;  %s722_s17 = smov %s632_s24 }
 0x2d1   : > { %s723_s18 = smov %s621_s21  ;;  %16 = sbr.rel (!%p14_p9) target bundleno = 3 (0x3), region = 71 }
 0x2d6   :  { %396 = vsyncpa [#allocation4], 1 }
 0x2d7   :  { %398 = vsyncpa [#allocation4 + $0x1], 1 }

</bundles_post_ra>
